<compile_context>
chip_gen: v7x
topology: tpu7x:2x2x1
jax: 0.10.0
libtpu: 0.0.40
codegen_flags: <defaults>
</compile_context>

<pallas_src>
import jax
import jax.numpy as jnp
from jax.experimental import pallas as pl
from jax.experimental.pallas import tpu as pltpu


def generator_kernel(x_ref, w1_ref, b1_ref, w2_ref, b2_ref, w3_ref, b3_ref, o_ref):
    # Layer 1: Linear(noise_dim -> hidden) + ReLU   (bf16 inputs, f32 accumulate)
    h = jnp.dot(x_ref[...], w1_ref[...], preferred_element_type=jnp.float32) + b1_ref[...]
    h = jnp.maximum(h, 0.0).astype(jnp.bfloat16)
    # Layer 2: Linear(hidden -> hidden) + ReLU
    h = jnp.dot(h, w2_ref[...], preferred_element_type=jnp.float32) + b2_ref[...]
    h = jnp.maximum(h, 0.0).astype(jnp.bfloat16)
    # Layer 3: Linear(hidden -> img_dim_padded), no activation (matches PyTorch module)
    out = jnp.dot(h, w3_ref[...], preferred_element_type=jnp.float32) + b3_ref[...]
    o_ref[...] = out.astype(o_ref.dtype)


def _round_up(x, m):
    return ((x + m - 1) // m) * m


def generator_forward(x, params, *, block_batch=256):
    """x: (B, noise_dim) float32. params: dict of w1,b1,w2,b2,w3,b3 (f32)."""
    w1, b1, w2, b2, w3, b3 = (params[k] for k in ("w1", "b1", "w2", "b2", "w3", "b3"))
    B, noise_dim = x.shape
    img_dim = w3.shape[1]
    out_dtype = x.dtype

    # Lane-dense output: pad the output dim (and w3/b3) up to a multiple of 128 so
    # stores are full vst instead of masked vst.msk. Sliced off after the call.
    img_pad = _round_up(img_dim, 128)
    if img_pad != img_dim:
        w3 = jnp.pad(w3, ((0, 0), (0, img_pad - img_dim)))
        b3 = jnp.pad(b3, ((0, 0), (0, img_pad - img_dim)))

    # Batch tiling: TM a multiple of 8 (f32 sublane), capped at block_batch.
    tm = min(block_batch, _round_up(B, 8))
    b_pad = _round_up(B, tm)
    if b_pad != B:
        x = jnp.pad(x, ((0, b_pad - B), (0, 0)))

    # bf16 activations/weights (native MXU rate, half the HBM traffic); f32 biases.
    xb = x.astype(jnp.bfloat16)
    w1b, w2b, w3b = (w.astype(jnp.bfloat16) for w in (w1, w2, w3))
    b1f, b2f, b3f = (b.astype(jnp.float32) for b in (b1, b2, b3))

    grid = (pl.cdiv(b_pad, tm),)
    resident = lambda shape: pl.BlockSpec(shape, lambda i: (0, 0))  # VMEM-resident

    out = pl.pallas_call(
        generator_kernel,
        out_shape=jax.ShapeDtypeStruct((b_pad, img_pad), out_dtype),
        grid=grid,
        in_specs=[
            pl.BlockSpec((tm, noise_dim), lambda i: (i, 0)),
            resident(w1b.shape), resident(b1f.shape),
            resident(w2b.shape), resident(b2f.shape),
            resident(w3b.shape), resident(b3f.shape),
        ],
        out_specs=pl.BlockSpec((tm, img_pad), lambda i: (i, 0)),
        compiler_params=pltpu.CompilerParams(
            dimension_semantics=("parallel",),
        ),
    )(xb, w1b, b1f, w2b, b2f, w3b, b3f)

    return out[:B, :img_dim]


def init_params(key, noise_dim, img_dim, hidden_dim=512):
    """Deterministic init mirroring nn.Linear shapes (stored transposed: (in, out))."""
    ks = jax.random.split(key, 6)

    def linear(kw, kb, fan_in, fan_out):
        bound = 1.0 / jnp.sqrt(fan_in)
        w = jax.random.uniform(kw, (fan_in, fan_out), jnp.float32, -bound, bound)
        b = jax.random.uniform(kb, (1, fan_out), jnp.float32, -bound, bound)
        return w, b

    w1, b1 = linear(ks[0], ks[1], noise_dim, hidden_dim)
    w2, b2 = linear(ks[2], ks[3], hidden_dim, hidden_dim)
    w3, b3 = linear(ks[4], ks[5], hidden_dim, img_dim)
    return {"w1": w1, "b1": b1, "w2": w2, "b2": b2, "w3": w3, "b3": b3}


if __name__ == "__main__":
    key = jax.random.PRNGKey(0)
    k_param, k_x = jax.random.split(key)

    noise_dim, img_dim, batch = 32, 64, 8
    params = init_params(k_param, noise_dim, img_dim)
    x = jax.random.normal(k_x, (batch, noise_dim), jnp.float32)

    out = generator_forward(x, params)
    out = jax.block_until_ready(out)
    assert out.shape == (batch, img_dim)

    # Reference 1: same mixed precision (bf16 inputs/weights, f32 accumulate) in pure JAX.
    f32 = lambda a: a.astype(jnp.bfloat16).astype(jnp.float32)
    h = jnp.maximum(f32(x) @ f32(params["w1"]) + params["b1"], 0.0)
    h = jnp.maximum(f32(h) @ f32(params["w2"]) + params["b2"], 0.0)
    ref_bf16 = f32(h) @ f32(params["w3"]) + params["b3"]
    assert jnp.allclose(out, ref_bf16, atol=2e-3, rtol=2e-3)

    # Reference 2: full-f32 math of the original module (loose tol due to bf16 weights).
    h = jnp.maximum(x @ params["w1"] + params["b1"], 0.0)
    h = jnp.maximum(h @ params["w2"] + params["b2"], 0.0)
    ref_f32 = h @ params["w3"] + params["b3"]
    assert jnp.allclose(out, ref_f32, atol=5e-2, rtol=5e-2)

    print("KERNEL_OK")
</pallas_src>

<mosaic_0001>
module attributes {stable_mosaic.version = 11 : i64} {
  func.func @generator_kernel(%arg0: i32, %arg1: memref<8x32xbf16, #tpu.memory_space<vmem>>, %arg2: memref<32x512xbf16, #tpu.memory_space<vmem>>, %arg3: memref<1x512xf32, #tpu.memory_space<vmem>>, %arg4: memref<512x512xbf16, #tpu.memory_space<vmem>>, %arg5: memref<1x512xf32, #tpu.memory_space<vmem>>, %arg6: memref<512x128xbf16, #tpu.memory_space<vmem>>, %arg7: memref<1x128xf32, #tpu.memory_space<vmem>>, %arg8: memref<8x128xf32, #tpu.memory_space<vmem>>) attributes {dimension_semantics = [#tpu.dimension_semantics<parallel>], iteration_bounds = array<i64: 1>, scalar_prefetch = 0 : i64, scratch_operands = 0 : i64, tpu.core_type = #tpu.core_type<tc>, window_params = [{transform_indices = @transform_0, window_bounds = array<i64: 8, 32>}, {pipeline_mode = #tpu.pipeline_mode<synchronous>, transform_indices = @transform_1, window_bounds = array<i64: 32, 512>}, {pipeline_mode = #tpu.pipeline_mode<synchronous>, transform_indices = @transform_2, window_bounds = array<i64: 1, 512>}, {pipeline_mode = #tpu.pipeline_mode<synchronous>, transform_indices = @transform_3, window_bounds = array<i64: 512, 512>}, {pipeline_mode = #tpu.pipeline_mode<synchronous>, transform_indices = @transform_4, window_bounds = array<i64: 1, 512>}, {pipeline_mode = #tpu.pipeline_mode<synchronous>, transform_indices = @transform_5, window_bounds = array<i64: 512, 128>}, {pipeline_mode = #tpu.pipeline_mode<synchronous>, transform_indices = @transform_6, window_bounds = array<i64: 1, 128>}, {transform_indices = @transform_7, window_bounds = array<i64: 8, 128>}]} {
    %c0 = arith.constant 0 : index
    %c0_0 = arith.constant 0 : index
    %0 = vector.load %arg1[%c0, %c0_0] : memref<8x32xbf16, #tpu.memory_space<vmem>>, vector<8x32xbf16>
    %c0_1 = arith.constant 0 : index
    %c0_2 = arith.constant 0 : index
    %1 = vector.load %arg2[%c0_1, %c0_2] : memref<32x512xbf16, #tpu.memory_space<vmem>>, vector<32x512xbf16>
    %cst = arith.constant dense<0.000000e+00> : vector<8x512xf32>
    %2 = tpu.matmul %0, %1, %cst {dimension_numbers = #tpu.dot_dimension_numbers<[1], [0], [0], [1], [0, 0, 1, 1], [], []>} : vector<8x32xbf16>, vector<32x512xbf16>, vector<8x512xf32> -> vector<8x512xf32>
    %c0_3 = arith.constant 0 : index
    %c0_4 = arith.constant 0 : index
    %3 = vector.load %arg3[%c0_3, %c0_4] : memref<1x512xf32, #tpu.memory_space<vmem>>, vector<1x512xf32>
    %4 = vector.broadcast %3 : vector<1x512xf32> to vector<8x512xf32>
    %5 = arith.addf %2, %4 : vector<8x512xf32>
    %cst_5 = arith.constant 0.000000e+00 : f32
    %6 = vector.broadcast %cst_5 : f32 to vector<8x512xf32>
    %7 = arith.maximumf %5, %6 : vector<8x512xf32>
    %8 = arith.truncf %7 : vector<8x512xf32> to vector<8x512xbf16>
    %c0_6 = arith.constant 0 : index
    %c0_7 = arith.constant 0 : index
    %9 = vector.load %arg4[%c0_6, %c0_7] : memref<512x512xbf16, #tpu.memory_space<vmem>>, vector<512x512xbf16>
    %cst_8 = arith.constant dense<0.000000e+00> : vector<8x512xf32>
    %10 = tpu.matmul %8, %9, %cst_8 {dimension_numbers = #tpu.dot_dimension_numbers<[1], [0], [0], [1], [0, 0, 1, 1], [], []>} : vector<8x512xbf16>, vector<512x512xbf16>, vector<8x512xf32> -> vector<8x512xf32>
    %c0_9 = arith.constant 0 : index
    %c0_10 = arith.constant 0 : index
    %11 = vector.load %arg5[%c0_9, %c0_10] : memref<1x512xf32, #tpu.memory_space<vmem>>, vector<1x512xf32>
    %12 = vector.broadcast %11 : vector<1x512xf32> to vector<8x512xf32>
    %13 = arith.addf %10, %12 : vector<8x512xf32>
    %cst_11 = arith.constant 0.000000e+00 : f32
    %14 = vector.broadcast %cst_11 : f32 to vector<8x512xf32>
    %15 = arith.maximumf %13, %14 : vector<8x512xf32>
    %16 = arith.truncf %15 : vector<8x512xf32> to vector<8x512xbf16>
    %c0_12 = arith.constant 0 : index
    %c0_13 = arith.constant 0 : index
    %17 = vector.load %arg6[%c0_12, %c0_13] : memref<512x128xbf16, #tpu.memory_space<vmem>>, vector<512x128xbf16>
    %cst_14 = arith.constant dense<0.000000e+00> : vector<8x128xf32>
    %18 = tpu.matmul %16, %17, %cst_14 {dimension_numbers = #tpu.dot_dimension_numbers<[1], [0], [0], [1], [0, 0, 1, 1], [], []>} : vector<8x512xbf16>, vector<512x128xbf16>, vector<8x128xf32> -> vector<8x128xf32>
    %c0_15 = arith.constant 0 : index
    %c0_16 = arith.constant 0 : index
    %19 = vector.load %arg7[%c0_15, %c0_16] : memref<1x128xf32, #tpu.memory_space<vmem>>, vector<1x128xf32>
    %20 = vector.broadcast %19 : vector<1x128xf32> to vector<8x128xf32>
    %21 = arith.addf %18, %20 : vector<8x128xf32>
    %c0_17 = arith.constant 0 : index
    %c0_18 = arith.constant 0 : index
    %22 = vector.load %arg8[%c0_17, %c0_18] : memref<8x128xf32, #tpu.memory_space<vmem>>, vector<8x128xf32>
    tpu.vector_store %arg8[%c0_17, %c0_18], %21 {strides = array<i32>} : memref<8x128xf32, #tpu.memory_space<vmem>>, vector<8x128xf32>,
    return
  }
  func.func @transform_0(%arg0: i32) -> (i32, i32) {
    %c0_i32 = arith.constant 0 : i32
    %c0_i32_0 = arith.constant 0 : i32
    return %arg0, %c0_i32 : i32, i32
  }
  func.func @transform_1(%arg0: i32) -> (i32, i32) {
    %c0_i32 = arith.constant 0 : i32
    %c0_i32_0 = arith.constant 0 : i32
    %c0_i32_1 = arith.constant 0 : i32
    return %c0_i32, %c0_i32_0 : i32, i32
  }
  func.func @transform_2(%arg0: i32) -> (i32, i32) {
    %c0_i32 = arith.constant 0 : i32
    %c0_i32_0 = arith.constant 0 : i32
    %c0_i32_1 = arith.constant 0 : i32
    return %c0_i32, %c0_i32_0 : i32, i32
  }
  func.func @transform_3(%arg0: i32) -> (i32, i32) {
    %c0_i32 = arith.constant 0 : i32
    %c0_i32_0 = arith.constant 0 : i32
    %c0_i32_1 = arith.constant 0 : i32
    return %c0_i32, %c0_i32_0 : i32, i32
  }
  func.func @transform_4(%arg0: i32) -> (i32, i32) {
    %c0_i32 = arith.constant 0 : i32
    %c0_i32_0 = arith.constant 0 : i32
    %c0_i32_1 = arith.constant 0 : i32
    return %c0_i32, %c0_i32_0 : i32, i32
  }
  func.func @transform_5(%arg0: i32) -> (i32, i32) {
    %c0_i32 = arith.constant 0 : i32
    %c0_i32_0 = arith.constant 0 : i32
    %c0_i32_1 = arith.constant 0 : i32
    return %c0_i32, %c0_i32_0 : i32, i32
  }
  func.func @transform_6(%arg0: i32) -> (i32, i32) {
    %c0_i32 = arith.constant 0 : i32
    %c0_i32_0 = arith.constant 0 : i32
    %c0_i32_1 = arith.constant 0 : i32
    return %c0_i32, %c0_i32_0 : i32, i32
  }
  func.func @transform_7(%arg0: i32) -> (i32, i32) {
    %c0_i32 = arith.constant 0 : i32
    %c0_i32_0 = arith.constant 0 : i32
    return %arg0, %c0_i32 : i32, i32
  }
}

</mosaic_0001>

<bundles_post_ra>
// kernel: tpu_custom_call.1
= control target key start
LH: loop header
LB: loop body
LE: loop exit
PB: predicated region body
PF: predicated region fallthrough
CT: control target
= control target key end

     0   :  { %12 = vsyncpa [#allocation3], 0  ;;  %s2316_s0 = inlined_call_operand.hbm [shape: bf16[8,32], index: 0, kind: input, shape index: {}]   ;;  %s2317_s1 = inlined_call_operand.hbm [shape: bf16[32,512], index: 1, kind: input, shape index: {}]   ;;  %s2318_s2 = inlined_call_operand.vmem [shape: f32[1,512], index: 2, kind: input, shape index: {}]   ;;  %s2319_s3 = inlined_call_operand.hbm [shape: bf16[512,512], index: 3, kind: input, shape index: {}]   ;;  %s2320_s4 = inlined_call_operand.vmem [shape: f32[1,512], index: 4, kind: input, shape index: {}]   ;;  %s2321_s5 = inlined_call_operand.hbm [shape: bf16[512,128], index: 5, kind: input, shape index: {}]   ;;  %s2322_s6 = inlined_call_operand.vmem [shape: f32[1,128], index: 6, kind: input, shape index: {}]   ;;  %s2323_s7 = inlined_call_operand.hbm [shape: f32[8,128], index: 7, kind: output, shape index: {}]  }
   0x1   :  { %13 = vsyncpa [#allocation6], 0 }
   0x2   :  { %14 = vsyncpa [#allocation9], 0 }
   0x3   :  { %15 = vsyncpa [#allocation4], 0  ;;  %s2160_s24 = smov [#allocation5]   ;;  %s2042_s28 = scalar_lea.hbm %s2317_s1, 1024 }
   0x4   :  { %s31_s25 = sshll.u32 %s2160_s24, 4  ;;  %p2043_p0 = scmp.ne.s32.totalorder %s2317_s1, %s2042_s28  ;;  %s32_s25 = int_to_ptr.vmem [resolvable:$true] %s31_s25 }
   0x5   :  { %p2046_p1 = scmp.lt.u32.totalorder %s2042_s28, %s2317_s1 }
   0x7   :  { %p2048_p2 = pnand %p2046_p1, %p2043_p0 }
   0x9   :  { %2051 = shalt.err (!%p2048_p2)
}
   0xa   :  { %s2052_s10 = scalar_lea.vmem %s32_s25, 1024  ;;  %p2057_p4 = scmp.lt.s32.totalorder %s32_s25, %s32_s25 }
   0xb   :  { %p2053_p3 = scmp.ne.s32.totalorder %s32_s25, %s2052_s10  ;;  %p2058_p5 = scmp.lt.s32.totalorder %s2052_s10, %s2052_s10 }
   0xd   :  { %p2059_p6 = por %p2058_p5, %p2057_p4 }
   0xf   :  { %p2060_p7 = pnand %p2059_p6, %p2053_p3 }
  0x11   :  { %2063 = shalt.err (!%p2060_p7)
}
  0x12   :  { %s2161_s11 = smov 256   ;;  %s2162_s12 = smov 16  }
  0x13   :  { %37 = dma.hbm_to_vmem [thread:$0]  %s2317_s1, 1024, %s32_s25, [#allocation6], %s2161_s11, %s2161_s11, %s2162_s12  }
  0x14   :  { %s2163_s15 = smov [#allocation2]   ;;  %s2164_s17 = smov [#allocation7]  }
  0x15   :  { %s22_s16 = sshll.u32 %s2163_s15, 4  ;;  %s45_s18 = sshll.u32 %s2164_s17, 4  ;;  %s23_s16 = int_to_ptr.vmem [resolvable:$true] %s22_s16  ;;  %s46_s18 = int_to_ptr.vmem [resolvable:$true] %s45_s18 }
  0x16   :  { %s2064_s21 = scalar_lea.hbm %s2316_s0, 64 }
  0x17   :  { %p2065_p8 = scmp.ne.s32.totalorder %s2316_s0, %s2064_s21  ;;  %p2068_p9 = scmp.lt.u32.totalorder %s2064_s21, %s2316_s0 }
  0x19   :  { %p2070_p10 = pnand %p2068_p9, %p2065_p8 }
  0x1b   :  { %2073 = shalt.err (!%p2070_p10)
}
  0x1c   :  { %s2074_s1 = scalar_lea.vmem %s23_s16, 64  ;;  %p2079_p12 = scmp.lt.s32.totalorder %s23_s16, %s23_s16 }
  0x1d   :  { %p2075_p11 = scmp.ne.s32.totalorder %s23_s16, %s2074_s1  ;;  %p2080_p13 = scmp.lt.s32.totalorder %s2074_s1, %s2074_s1 }
  0x1f   :  { %p2081_p0 = por %p2080_p13, %p2079_p12 }
  0x21   :  { %p2082_p1 = pnand %p2081_p0, %p2075_p11 }
  0x23   :  { %2085 = shalt.err (!%p2082_p1)
}
  0x24   :  { %25 = dma.hbm_to_vmem [thread:$0]  %s2316_s0, 64, %s23_s16, [#allocation3]  }
  0x25   :  { %s2086_s30 = scalar_lea.hbm %s2319_s3, 16384 }
  0x26   :  { %p2087_p2 = scmp.ne.s32.totalorder %s2319_s3, %s2086_s30  ;;  %p2090_p3 = scmp.lt.u32.totalorder %s2086_s30, %s2319_s3 }
  0x28   :  { %p2092_p4 = pnand %p2090_p3, %p2087_p2 }
  0x2a   :  { %2095 = shalt.err (!%p2092_p4)
}
  0x2b   :  { %s2096_s14 = scalar_lea.vmem %s46_s18, 16384  ;;  %p2101_p6 = scmp.lt.s32.totalorder %s46_s18, %s46_s18 }
  0x2c   :  { %p2097_p5 = scmp.ne.s32.totalorder %s46_s18, %s2096_s14  ;;  %p2102_p7 = scmp.lt.s32.totalorder %s2096_s14, %s2096_s14 }
  0x2e   :  { %p2103_p8 = por %p2102_p7, %p2101_p6 }
  0x30   :  { %p2104_p9 = pnand %p2103_p8, %p2097_p5 }
  0x32   :  { %2107 = shalt.err (!%p2104_p9)
}
  0x33   :  { %51 = dma.hbm_to_vmem [thread:$0]  %s2319_s3, 16384, %s46_s18, [#allocation6], %s2161_s11, %s2161_s11, %s2162_s12  }
  0x34   :  { %s2165_s16 = smov [#allocation8]   ;;  %s2108_s21 = scalar_lea.hbm %s2321_s5, 4096 }
  0x35   :  { %s59_s17 = sshll.u32 %s2165_s16, 4  ;;  %p2109_p10 = scmp.ne.s32.totalorder %s2321_s5, %s2108_s21  ;;  %s60_s17 = int_to_ptr.vmem [resolvable:$true] %s59_s17 }
  0x36   :  { %p2112_p11 = scmp.lt.u32.totalorder %s2108_s21, %s2321_s5 }
  0x38   :  { %p2114_p12 = pnand %p2112_p11, %p2109_p10 }
  0x3a   :  { %2117 = shalt.err (!%p2114_p12)
}
  0x3b   :  { %s2118_s1 = scalar_lea.vmem %s60_s17, 4096  ;;  %p2123_p0 = scmp.lt.s32.totalorder %s60_s17, %s60_s17 }
  0x3c   :  { %p2119_p13 = scmp.ne.s32.totalorder %s60_s17, %s2118_s1  ;;  %p2124_p1 = scmp.lt.s32.totalorder %s2118_s1, %s2118_s1 }
  0x3e   :  { %p2125_p2 = por %p2124_p1, %p2123_p0 }
  0x40   :  { %p2126_p3 = pnand %p2125_p2, %p2119_p13 }
  0x42   :  { %2129 = shalt.err (!%p2126_p3)
}
  0x43   :  { %s2166_s3 = smov 64   ;;  %s2167_s11 = smov 4  }
  0x44   :  { %65 = dma.hbm_to_vmem [thread:$0]  %s2321_s5, 4096, %s60_s17, [#allocation9], %s2166_s3, %s2166_s3, %s2167_s11  }
  0x45   :  { %2152 = dma.done.wait [#allocation3], 64  }
  0x46   :  { %2153 = vsyncadd [#allocation3], 4294967232 }
  0x47   :  { %2154 = dma.done.wait [#allocation6], 17408  }
  0x48   :  { %2155 = vsyncadd [#allocation6], 4294949888 }
  0x49   :  { %2156 = dma.done.wait [#allocation9], 4096  }
  0x4a   :  { %2157 = vsyncadd [#allocation9], 4294963200  ;;  %v2168_v0 = vmov 0   ;;  %v1806_v1 = vld [vmem:[#allocation5 + $0x4] ss:$16 sps:$4 sm:$0xff]   ;;  %vm152_vm0 = vcmask 261120  }
  0x4b   :  { %188 = vmatprep.mubr.bf16.mxu0 %v2168_v0  ;;  %229 = vmatprep.mubr.bf16.mxu1 %v2168_v0  ;;  %v1808_v2 = vld [vmem:[#allocation5] ss:$16 sps:$4 sm:$0xff]   ;;  %v1809_v3 = vld [vmem:[#allocation5 + $0x24] ss:$16 sps:$4 sm:$0xff]   ;;  %v1812_v5 = vld [vmem:[#allocation5 + $0xc] ss:$16 sps:$4 sm:$0xff]  }
  0x4c   :  { %156 = vmatprep.subr.bf16.mxu0 %v1806_v1  ;;  %v1811_v4 = vld [vmem:[#allocation5 + $0x20] ss:$16 sps:$4 sm:$0xff]   ;;  %v1814_v6 = vld [vmem:[#allocation5 + $0x8] ss:$16 sps:$4 sm:$0xff]   ;;  %v81_v7 = vld [vmem:[#allocation2] sm:$0xf]  ;;  %197 = vmatprep.subr.bf16.mxu1 %v1812_v5 }
  0x4d   :  { %157 = vmatpush1.bf16.msra.mxu0 %v1808_v2  ;;  %v1815_v8 = vld [vmem:[#allocation5 + $0x2c] ss:$16 sps:$4 sm:$0xff]   ;;  %198 = vmatpush1.bf16.msra.mxu1 %v1814_v6  ;;  %v1817_v9 = vld [vmem:[#allocation5 + $0x28] ss:$16 sps:$4 sm:$0xff]   ;;  %v1820_v10 = vld [vmem:[#allocation7 + $0x4] ss:$16 sps:$4 sm:$0xff]  }
  0x4e   :  { %158 = vmatprep.subr.bf16.mxu0 %v1809_v3  ;;  %199 = vmatprep.subr.bf16.mxu1 %v1815_v8  ;;  %v1818_v11 = vld [vmem:[#allocation7] ss:$16 sps:$4 sm:$0xff]   ;;  %v1823_v12 = vld [vmem:[#allocation7 + $0xc] ss:$16 sps:$4 sm:$0xff]   ;;  %v1826_v13 = vld [vmem:[#allocation7 + $0x24] ss:$16 sps:$4 sm:$0xff]  }
  0x4f   :  { %v1821_v14 = vld [vmem:[#allocation7 + $0x8] ss:$16 sps:$4 sm:$0xff]   ;;  %v1824_v15 = vld [vmem:[#allocation7 + $0x20] ss:$16 sps:$4 sm:$0xff]   ;;  %v1829_v16 = vld [vmem:[#allocation7 + $0x2c] ss:$16 sps:$4 sm:$0xff]  }
  0x50   :  { %v1832_v17 = vld [vmem:[#allocation7 + $0x44] ss:$16 sps:$4 sm:$0xff]   ;;  %v1827_v18 = vld [vmem:[#allocation7 + $0x28] ss:$16 sps:$4 sm:$0xff]   ;;  %v1830_v19 = vld [vmem:[#allocation7 + $0x40] ss:$16 sps:$4 sm:$0xff]  }
  0x51   :  { %159 = vmatpush1.bf16.msra.mxu0 %v1811_v4  ;;  %200 = vmatpush1.bf16.msra.mxu1 %v1817_v9  ;;  %v1835_v20 = vld [vmem:[#allocation7 + $0x4c] ss:$16 sps:$4 sm:$0xff]   ;;  %v1838_v21 = vld [vmem:[#allocation7 + $0x64] ss:$16 sps:$4 sm:$0xff]   ;;  %v1833_v22 = vld [vmem:[#allocation7 + $0x48] ss:$16 sps:$4 sm:$0xff]  }
  0x52   :  { %1036 = vmatprep.subr.bf16.mxu0 %v1820_v10  ;;  %1118 = vmatprep.subr.bf16.mxu1 %v1823_v12  ;;  %v1836_v23 = vld [vmem:[#allocation7 + $0x60] ss:$16 sps:$4 sm:$0xff]   ;;  %v1841_v24 = vld [vmem:[#allocation7 + $0x6c] ss:$16 sps:$4 sm:$0xff]   ;;  %v1844_v25 = vld [vmem:[#allocation7 + $0x84] ss:$16 sps:$4 sm:$0xff]   ;;  %v92_v12 = vlaneseq }
  0x53   :  { %v1839_v26 = vld [vmem:[#allocation7 + $0x68] ss:$16 sps:$4 sm:$0xff]   ;;  %v1842_v27 = vld [vmem:[#allocation7 + $0x80] ss:$16 sps:$4 sm:$0xff]   ;;  %v1847_v28 = vld [vmem:[#allocation7 + $0x8c] ss:$16 sps:$4 sm:$0xff]  }
  0x54   :  { %1577 = vmatmul.mubr.msk.bf16.vlgmr.msra.gmra.mrb[0].mxu0 %vm152_vm0, %v81_v7  ;;  %1578 = vmatmul.mubr.msk.bf16.vlgmr.msra.gmra.mrb[0].mxu1 %vm152_vm0, %v81_v7  ;;  %v1850_v29 = vld [vmem:[#allocation7 + $0xa4] ss:$16 sps:$4 sm:$0xff]   ;;  %v1845_v30 = vld [vmem:[#allocation7 + $0x88] ss:$16 sps:$4 sm:$0xff]   ;;  %v1848_v31 = vld [vmem:[#allocation7 + $0xa0] ss:$16 sps:$4 sm:$0xff]  }
  0x55   :  { %1037 = vmatpush1.bf16.msra.mxu0 %v1818_v11  ;;  %1119 = vmatpush1.bf16.msra.mxu1 %v1821_v14  ;;  %v1853_v32 = vld [vmem:[#allocation7 + $0xac] ss:$16 sps:$4 sm:$0xff]   ;;  %v1856_v33 = vld [vmem:[#allocation7 + $0xc4] ss:$16 sps:$4 sm:$0xff]   ;;  %v1851_v34 = vld [vmem:[#allocation7 + $0xa8] ss:$16 sps:$4 sm:$0xff]  }
  0x56   :  { %1038 = vmatprep.subr.bf16.mxu0 %v1826_v13  ;;  %1120 = vmatprep.subr.bf16.mxu1 %v1829_v16  ;;  %v1854_v35 = vld [vmem:[#allocation7 + $0xc0] ss:$16 sps:$4 sm:$0xff]   ;;  %v1859_v36 = vld [vmem:[#allocation7 + $0xcc] ss:$16 sps:$4 sm:$0xff]   ;;  %v1862_v37 = vld [vmem:[#allocation7 + $0xe4] ss:$16 sps:$4 sm:$0xff]  }
  0x57   :  { %v1857_v38 = vld [vmem:[#allocation7 + $0xc8] ss:$16 sps:$4 sm:$0xff]   ;;  %v1860_v39 = vld [vmem:[#allocation7 + $0xe0] ss:$16 sps:$4 sm:$0xff]   ;;  %v1865_v40 = vld [vmem:[#allocation7 + $0xec] ss:$16 sps:$4 sm:$0xff]  }
  0x58   :  { %v1868_v41 = vld [vmem:[#allocation7 + $0x104] ss:$16 sps:$4 sm:$0xff]   ;;  %v1863_v42 = vld [vmem:[#allocation7 + $0xe8] ss:$16 sps:$4 sm:$0xff]   ;;  %v1866_v43 = vld [vmem:[#allocation7 + $0x100] ss:$16 sps:$4 sm:$0xff]  }
  0x59   :  { %1039 = vmatpush1.bf16.msra.mxu0 %v1824_v15  ;;  %1121 = vmatpush1.bf16.msra.mxu1 %v1827_v18  ;;  %v1871_v44 = vld [vmem:[#allocation7 + $0x10c] ss:$16 sps:$4 sm:$0xff]   ;;  %v1874_v45 = vld [vmem:[#allocation7 + $0x124] ss:$16 sps:$4 sm:$0xff]   ;;  %v1869_v46 = vld [vmem:[#allocation7 + $0x108] ss:$16 sps:$4 sm:$0xff]  }
  0x5a   :  { %1040 = vmatprep.subr.bf16.mxu0 %v1832_v17  ;;  %1122 = vmatprep.subr.bf16.mxu1 %v1835_v20  ;;  %v1872_v47 = vld [vmem:[#allocation7 + $0x120] ss:$16 sps:$4 sm:$0xff]   ;;  %v1877_v48 = vld [vmem:[#allocation7 + $0x12c] ss:$16 sps:$4 sm:$0xff]   ;;  %v1880_v49 = vld [vmem:[#allocation7 + $0x144] ss:$16 sps:$4 sm:$0xff]  }
  0x5b   :  { %v1875_v50 = vld [vmem:[#allocation7 + $0x128] ss:$16 sps:$4 sm:$0xff]   ;;  %v1878_v51 = vld [vmem:[#allocation7 + $0x140] ss:$16 sps:$4 sm:$0xff]   ;;  %v1883_v52 = vld [vmem:[#allocation7 + $0x14c] ss:$16 sps:$4 sm:$0xff]  }
  0x5c   :  { %v1886_v53 = vld [vmem:[#allocation7 + $0x164] ss:$16 sps:$4 sm:$0xff]   ;;  %v1881_v54 = vld [vmem:[#allocation7 + $0x148] ss:$16 sps:$4 sm:$0xff]   ;;  %v1884_v55 = vld [vmem:[#allocation7 + $0x160] ss:$16 sps:$4 sm:$0xff]  }
  0x5d   :  { %1041 = vmatpush1.bf16.msra.mxu0 %v1830_v19  ;;  %1123 = vmatpush1.bf16.msra.mxu1 %v1833_v22  ;;  %v1889_v56 = vld [vmem:[#allocation7 + $0x16c] ss:$16 sps:$4 sm:$0xff]   ;;  %v1892_v57 = vld [vmem:[#allocation7 + $0x184] ss:$16 sps:$4 sm:$0xff]   ;;  %v1887_v58 = vld [vmem:[#allocation7 + $0x168] ss:$16 sps:$4 sm:$0xff]  }
  0x5e   :  { %1042 = vmatprep.subr.bf16.mxu0 %v1838_v21  ;;  %1124 = vmatprep.subr.bf16.mxu1 %v1841_v24  ;;  %v1890_v59 = vld [vmem:[#allocation7 + $0x180] ss:$16 sps:$4 sm:$0xff]   ;;  %v1895_v60 = vld [vmem:[#allocation7 + $0x18c] ss:$16 sps:$4 sm:$0xff]   ;;  %v1898_v61 = vld [vmem:[#allocation7 + $0x1a4] ss:$16 sps:$4 sm:$0xff]  }
  0x5f   :  { %v1893_v62 = vld [vmem:[#allocation7 + $0x188] ss:$16 sps:$4 sm:$0xff]   ;;  %v1896_v63 = vld [vmem:[#allocation7 + $0x1a0] ss:$16 sps:$4 sm:$0xff]   ;;  %v1901_v0 = vld [vmem:[#allocation7 + $0x1ac] ss:$16 sps:$4 sm:$0xff]  }
  0x60   :  { %v1899_v1 = vld [vmem:[#allocation7 + $0x1a8] ss:$16 sps:$4 sm:$0xff]   ;;  %v1904_v2 = vld [vmem:[#allocation7 + $0x1c4] ss:$16 sps:$4 sm:$0xff]   ;;  %v1907_v3 = vld [vmem:[#allocation7 + $0x1cc] ss:$16 sps:$4 sm:$0xff]  }
  0x61   :  { %1043 = vmatpush1.bf16.msra.mxu0 %v1836_v23  ;;  %1125 = vmatpush1.bf16.msra.mxu1 %v1839_v26  ;;  %v1902_v4 = vld [vmem:[#allocation7 + $0x1c0] ss:$16 sps:$4 sm:$0xff]   ;;  %v1905_v5 = vld [vmem:[#allocation7 + $0x1c8] ss:$16 sps:$4 sm:$0xff]   ;;  %v1910_v6 = vld [vmem:[#allocation7 + $0x1e4] ss:$16 sps:$4 sm:$0xff]  }
  0x62   :  { %1044 = vmatprep.subr.bf16.mxu0 %v1844_v25  ;;  %1126 = vmatprep.subr.bf16.mxu1 %v1847_v28  ;;  %v1913_v7 = vld [vmem:[#allocation7 + $0x1ec] ss:$16 sps:$4 sm:$0xff]   ;;  %v1908_v8 = vld [vmem:[#allocation7 + $0x1e0] ss:$16 sps:$4 sm:$0xff]   ;;  %v1911_v9 = vld [vmem:[#allocation7 + $0x1e8] ss:$16 sps:$4 sm:$0xff]  }
  0x63   :  { %v1916_v10 = vld [vmem:[#allocation7 + $0x204] ss:$16 sps:$4 sm:$0xff]   ;;  %v1919_v11 = vld [vmem:[#allocation7 + $0x20c] ss:$16 sps:$4 sm:$0xff]   ;;  %v2264_v13 = vshrl.u32 %v92_v12, 7  ;;  %s2169_s29 = smov [#allocation10]  }
  0x64   :  { %v2270_v15 = vld [vmem:[%s2318_s2] sm:$0xf]  ;;  %v1976_v12 = vld [vmem:[#allocation7 + $0x344] ss:$16 sps:$4 sm:$0xff]   ;;  %s1558_s30 = sshll.u32 %s2169_s29, 4  ;;  %s1559_s30 = int_to_ptr.vmem [resolvable:$true] %s1558_s30 }
  0x65   :  { %1045 = vmatpush1.bf16.msra.mxu0 %v1842_v27  ;;  %1127 = vmatpush1.bf16.msra.mxu1 %v1845_v30  ;;  %v94_v14 = vsub.s32 0, %v2264_v13  ;;  %v98_v16 = vsub.s32 1, %v2264_v13  ;;  %v106_v18 = vsub.s32 3, %v2264_v13  ;;  %s2130_s8 = scalar_lea.vmem %s1559_s30, 128  ;;  %p2135_p5 = scmp.lt.s32.totalorder %s1559_s30, %s1559_s30 }
  0x66   :  { %1046 = vmatprep.subr.bf16.mxu0 %v1850_v29  ;;  %1128 = vmatprep.subr.bf16.mxu1 %v1853_v32  ;;  %p2131_p4 = scmp.ne.s32.totalorder %s1559_s30, %s2130_s8  ;;  %p2136_p6 = scmp.lt.s32.totalorder %s2130_s8, %s2130_s8 }
  0x67   :  { %v95_v17 = vrot.slane %v2270_v15, %v94_v14  ;;  %v99_v19 = vrot.slane %v2270_v15, %v98_v16  ;;  %v107_v23 = vrot.slane %v2270_v15, %v106_v18 }
  0x68   :  { %p2137_p7 = por %p2136_p6, %p2135_p5 }
  0x69   :  { %1047 = vmatpush1.bf16.msra.mxu0 %v1848_v31  ;;  %1129 = vmatpush1.bf16.msra.mxu1 %v1851_v34  ;;  %v1914_v34 = vld [vmem:[#allocation7 + $0x200] ss:$16 sps:$4 sm:$0xff]  }
  0x6a   :  { %1048 = vmatprep.subr.bf16.mxu0 %v1856_v33  ;;  %1130 = vmatprep.subr.bf16.mxu1 %v1859_v36  ;;  %p2138_p8 = pnand %p2137_p7, %p2131_p4 }
  0x6d   :  { %1049 = vmatpush1.bf16.msra.mxu0 %v1854_v35  ;;  %1131 = vmatpush1.bf16.msra.mxu1 %v1857_v38  ;;  %v1917_v35 = vld [vmem:[#allocation7 + $0x208] ss:$16 sps:$4 sm:$0xff]   ;;  %v1922_v38 = vld [vmem:[#allocation7 + $0x224] ss:$16 sps:$4 sm:$0xff]  }
  0x6e   :  { %1050 = vmatprep.subr.bf16.mxu0 %v1862_v37  ;;  %1132 = vmatprep.subr.bf16.mxu1 %v1865_v40 }
  0x71   :  { %1051 = vmatpush1.bf16.msra.mxu0 %v1860_v39  ;;  %1133 = vmatpush1.bf16.msra.mxu1 %v1863_v42  ;;  %v1925_v39 = vld [vmem:[#allocation7 + $0x22c] ss:$16 sps:$4 sm:$0xff]   ;;  %v1920_v42 = vld [vmem:[#allocation7 + $0x220] ss:$16 sps:$4 sm:$0xff]  }
  0x72   :  { %1052 = vmatprep.subr.bf16.mxu0 %v1868_v41  ;;  %1134 = vmatprep.subr.bf16.mxu1 %v1871_v44  ;;  %v1928_v44 = vld [vmem:[#allocation7 + $0x244] ss:$16 sps:$4 sm:$0xff]  }
  0x75   :  { %1053 = vmatpush1.bf16.msra.mxu0 %v1866_v43  ;;  %1135 = vmatpush1.bf16.msra.mxu1 %v1869_v46  ;;  %v1923_v43 = vld [vmem:[#allocation7 + $0x228] ss:$16 sps:$4 sm:$0xff]   ;;  %v1926_v46 = vld [vmem:[#allocation7 + $0x240] ss:$16 sps:$4 sm:$0xff]  }
  0x76   :  { %1054 = vmatprep.subr.bf16.mxu0 %v1874_v45  ;;  %1136 = vmatprep.subr.bf16.mxu1 %v1877_v48  ;;  %v1931_v45 = vld [vmem:[#allocation7 + $0x24c] ss:$16 sps:$4 sm:$0xff]   ;;  %v1934_v48 = vld [vmem:[#allocation7 + $0x264] ss:$16 sps:$4 sm:$0xff]  }
  0x79   :  { %1055 = vmatpush1.bf16.msra.mxu0 %v1872_v47  ;;  %1137 = vmatpush1.bf16.msra.mxu1 %v1875_v50  ;;  %v1929_v47 = vld [vmem:[#allocation7 + $0x248] ss:$16 sps:$4 sm:$0xff]   ;;  %v1932_v50 = vld [vmem:[#allocation7 + $0x260] ss:$16 sps:$4 sm:$0xff]  }
  0x7a   :  { %1056 = vmatprep.subr.bf16.mxu0 %v1880_v49  ;;  %1138 = vmatprep.subr.bf16.mxu1 %v1883_v52  ;;  %v1937_v49 = vld [vmem:[#allocation7 + $0x26c] ss:$16 sps:$4 sm:$0xff]   ;;  %v1940_v52 = vld [vmem:[#allocation7 + $0x284] ss:$16 sps:$4 sm:$0xff]  }
  0x7d   :  { %1057 = vmatpush1.bf16.msra.mxu0 %v1878_v51  ;;  %1139 = vmatpush1.bf16.msra.mxu1 %v1881_v54  ;;  %v1935_v51 = vld [vmem:[#allocation7 + $0x268] ss:$16 sps:$4 sm:$0xff]   ;;  %v1938_v54 = vld [vmem:[#allocation7 + $0x280] ss:$16 sps:$4 sm:$0xff]  }
  0x7e   :  { %1058 = vmatprep.subr.bf16.mxu0 %v1886_v53  ;;  %1140 = vmatprep.subr.bf16.mxu1 %v1889_v56  ;;  %v1943_v53 = vld [vmem:[#allocation7 + $0x28c] ss:$16 sps:$4 sm:$0xff]   ;;  %v1946_v56 = vld [vmem:[#allocation7 + $0x2a4] ss:$16 sps:$4 sm:$0xff]  }
  0x81   :  { %1059 = vmatpush1.bf16.msra.mxu0 %v1884_v55  ;;  %1141 = vmatpush1.bf16.msra.mxu1 %v1887_v58  ;;  %v1941_v55 = vld [vmem:[#allocation7 + $0x288] ss:$16 sps:$4 sm:$0xff]   ;;  %v1944_v58 = vld [vmem:[#allocation7 + $0x2a0] ss:$16 sps:$4 sm:$0xff]  }
  0x82   :  { %1060 = vmatprep.subr.bf16.mxu0 %v1892_v57  ;;  %1142 = vmatprep.subr.bf16.mxu1 %v1895_v60  ;;  %v1949_v57 = vld [vmem:[#allocation7 + $0x2ac] ss:$16 sps:$4 sm:$0xff]   ;;  %v1952_v60 = vld [vmem:[#allocation7 + $0x2c4] ss:$16 sps:$4 sm:$0xff]  }
  0x85   :  { %1061 = vmatpush1.bf16.msra.mxu0 %v1890_v59  ;;  %1143 = vmatpush1.bf16.msra.mxu1 %v1893_v62  ;;  %v1947_v59 = vld [vmem:[#allocation7 + $0x2a8] ss:$16 sps:$4 sm:$0xff]   ;;  %v1950_v62 = vld [vmem:[#allocation7 + $0x2c0] ss:$16 sps:$4 sm:$0xff]  }
  0x86   :  { %1062 = vmatprep.subr.bf16.mxu0 %v1898_v61  ;;  %1144 = vmatprep.subr.bf16.mxu1 %v1901_v0  ;;  %v1955_v61 = vld [vmem:[#allocation7 + $0x2cc] ss:$16 sps:$4 sm:$0xff]   ;;  %v1958_v0 = vld [vmem:[#allocation7 + $0x2e4] ss:$16 sps:$4 sm:$0xff]  }
  0x89   :  { %1063 = vmatpush1.bf16.msra.mxu0 %v1896_v63  ;;  %1145 = vmatpush1.bf16.msra.mxu1 %v1899_v1  ;;  %v1953_v63 = vld [vmem:[#allocation7 + $0x2c8] ss:$16 sps:$4 sm:$0xff]   ;;  %v1961_v1 = vld [vmem:[#allocation7 + $0x2ec] ss:$16 sps:$4 sm:$0xff]  }
  0x8a   :  { %1064 = vmatprep.subr.bf16.mxu0 %v1904_v2  ;;  %1146 = vmatprep.subr.bf16.mxu1 %v1907_v3  ;;  %v1956_v2 = vld [vmem:[#allocation7 + $0x2e0] ss:$16 sps:$4 sm:$0xff]   ;;  %v1959_v3 = vld [vmem:[#allocation7 + $0x2e8] ss:$16 sps:$4 sm:$0xff]  }
  0x8d   :  { %1065 = vmatpush1.bf16.msra.mxu0 %v1902_v4  ;;  %1147 = vmatpush1.bf16.msra.mxu1 %v1905_v5  ;;  %v1964_v4 = vld [vmem:[#allocation7 + $0x304] ss:$16 sps:$4 sm:$0xff]   ;;  %v1967_v5 = vld [vmem:[#allocation7 + $0x30c] ss:$16 sps:$4 sm:$0xff]  }
  0x8e   :  { %1066 = vmatprep.subr.bf16.mxu0 %v1910_v6  ;;  %1148 = vmatprep.subr.bf16.mxu1 %v1913_v7  ;;  %v1962_v6 = vld [vmem:[#allocation7 + $0x300] ss:$16 sps:$4 sm:$0xff]   ;;  %v1965_v7 = vld [vmem:[#allocation7 + $0x308] ss:$16 sps:$4 sm:$0xff]  }
  0x91   :  { %1067 = vmatpush1.bf16.msra.mxu0 %v1908_v8  ;;  %1149 = vmatpush1.bf16.msra.mxu1 %v1911_v9  ;;  %v1970_v8 = vld [vmem:[#allocation7 + $0x324] ss:$16 sps:$4 sm:$0xff]   ;;  %v1973_v9 = vld [vmem:[#allocation7 + $0x32c] ss:$16 sps:$4 sm:$0xff]  }
  0x92   :  { %1077 = vmatprep.subr.bf16.mxu0 %v1916_v10  ;;  %1159 = vmatprep.subr.bf16.mxu1 %v1919_v11  ;;  %v1968_v10 = vld [vmem:[#allocation7 + $0x320] ss:$16 sps:$4 sm:$0xff]   ;;  %v1971_v11 = vld [vmem:[#allocation7 + $0x328] ss:$16 sps:$4 sm:$0xff]  }
 0x127   :  { %v190_v20 = vpop.f32.mrb[0].mxu0  ;;  %v2283_v28 = vpop.f32.mrb[0].mxu1 }
 0x128   :  { %v191_v21 = vadd.f32 %v190_v20, %v95_v17  ;;  %v192_v22 = vpop.f32.mrb[1].mxu0  ;;  %v233_v30 = vpop.f32.mrb[1].mxu1  ;;  %v1979_v17 = vld [vmem:[#allocation7 + $0x34c] ss:$16 sps:$4 sm:$0xff]   ;;  %v1977_v20 = vld [vmem:[#allocation7 + $0x348] ss:$16 sps:$4 sm:$0xff]  }
 0x129   :  { %v193_v24 = vadd.f32 %v192_v22, %v99_v19  ;;  %v194_v25 = vpop.f32.mrb[2].mxu0  ;;  %v234_v31 = vadd.f32 %v233_v30, %v107_v23  ;;  %v235_v32 = vpop.f32.mrb[2].mxu1  ;;  %v1974_v19 = vld [vmem:[#allocation7 + $0x340] ss:$16 sps:$4 sm:$0xff]   ;;  %v1985_v22 = vld [vmem:[#allocation7 + $0x36c] ss:$16 sps:$4 sm:$0xff]  }
 0x12a   :  { %v238_v26 = vmax.f32 %v191_v21, 0.0  ;;  %v195_v27 = vpop.f32.mrb[3].mxu0  ;;  %v236_v36 = vpop.f32.mrb[3].mxu1  ;;  %v1982_v21 = vld [vmem:[#allocation7 + $0x364] ss:$16 sps:$4 sm:$0xff]   ;;  %v102_v30 = vsub.s32 2, %v2264_v13 }
 0x12b   :  { %v239_v29 = vmax.f32 %v193_v24, 0.0  ;;  %v241_v40 = vmax.f32 %v234_v31, 0.0  ;;  %v1980_v23 = vld [vmem:[#allocation7 + $0x360] ss:$16 sps:$4 sm:$0xff]   ;;  %v1983_v24 = vld [vmem:[#allocation7 + $0x368] ss:$16 sps:$4 sm:$0xff]  }
 0x12c   :  { %v242_v37 = vpack.c.bf16 %v238_v26, %v238_v26  ;;  %v1988_v25 = vld [vmem:[#allocation7 + $0x384] ss:$16 sps:$4 sm:$0xff]   ;;  %v1991_v26 = vld [vmem:[#allocation7 + $0x38c] ss:$16 sps:$4 sm:$0xff]   ;;  %v1986_v27 = vld [vmem:[#allocation7 + $0x380] ss:$16 sps:$4 sm:$0xff]  }
 0x12d   :  { %v243_v33 = vpack.c.bf16 %v239_v29, %v239_v29  ;;  %v245_v41 = vpack.c.bf16 %v241_v40, %v241_v40  ;;  %v1989_v29 = vld [vmem:[#allocation7 + $0x388] ss:$16 sps:$4 sm:$0xff]   ;;  %v1994_v31 = vld [vmem:[#allocation7 + $0x3a4] ss:$16 sps:$4 sm:$0xff]   ;;  %v1997_v32 = vld [vmem:[#allocation7 + $0x3ac] ss:$16 sps:$4 sm:$0xff]  }
 0x12e   :  { %v2000_v36 = vld [vmem:[#allocation7 + $0x3c4] ss:$16 sps:$4 sm:$0xff]  }
 0x12f   :  { %1068 = vmatprep.mubr.bf16.mxu0 %v243_v33  ;;  %1150 = vmatprep.mubr.bf16.mxu1 %v243_v33  ;;  %v1992_v33 = vld [vmem:[#allocation7 + $0x3a0] ss:$16 sps:$4 sm:$0xff]  }
 0x130   :  { %1069 = vmatmul.mubr.bf16.vlgmr.msra.gmra.mrb[4].mxu0 %v242_v37  ;;  %1151 = vmatmul.mubr.bf16.vlgmr.msra.gmra.mrb[4].mxu1 %v242_v37  ;;  %v2003_v37 = vld [vmem:[#allocation7 + $0x3cc] ss:$16 sps:$4 sm:$0xff]  }
 0x131   :  { %1078 = vmatpush1.bf16.msra.mxu0 %v1914_v34  ;;  %1160 = vmatpush1.bf16.msra.mxu1 %v1917_v35  ;;  %v1995_v34 = vld [vmem:[#allocation7 + $0x3a8] ss:$16 sps:$4 sm:$0xff]   ;;  %v103_v35 = vrot.slane %v2270_v15, %v102_v30  ;;  %v2010_v15 = vld [vmem:[#allocation8 + $0x40] sm:$0xff]  }
 0x132   :  { %1079 = vmatprep.subr.bf16.mxu0 %v1922_v38  ;;  %1161 = vmatprep.subr.bf16.mxu1 %v1925_v39  ;;  %v1998_v38 = vld [vmem:[#allocation7 + $0x3c0] ss:$16 sps:$4 sm:$0xff]   ;;  %v2001_v39 = vld [vmem:[#allocation7 + $0x3c8] ss:$16 sps:$4 sm:$0xff]  }
 0x133   :  { %1109 = vmatprep.mubr.bf16.mxu0 %v245_v41  ;;  %1191 = vmatprep.mubr.bf16.mxu1 %v245_v41  ;;  %v232_v40 = vadd.f32 %v2283_v28, %v103_v35  ;;  %v2006_v41 = vld [vmem:[#allocation7 + $0x3e4] ss:$16 sps:$4 sm:$0xff]   ;;  %v2014_v28 = vld [vmem:[#allocation8 + $0x48] sm:$0xff]  }
 0x135   :  { %1080 = vmatpush1.bf16.msra.mxu0 %v1920_v42  ;;  %1162 = vmatpush1.bf16.msra.mxu1 %v1923_v43  ;;  %v2009_v42 = vld [vmem:[#allocation7 + $0x3ec] ss:$16 sps:$4 sm:$0xff]   ;;  %v2004_v43 = vld [vmem:[#allocation7 + $0x3e0] ss:$16 sps:$4 sm:$0xff]  }
 0x136   :  { %1081 = vmatprep.subr.bf16.mxu0 %v1928_v44  ;;  %1163 = vmatprep.subr.bf16.mxu1 %v1931_v45  ;;  %v2007_v44 = vld [vmem:[#allocation7 + $0x3e8] ss:$16 sps:$4 sm:$0xff]   ;;  %v240_v45 = vmax.f32 %v232_v40, 0.0 }
 0x139   :  { %1082 = vmatpush1.bf16.msra.mxu0 %v1926_v46  ;;  %1164 = vmatpush1.bf16.msra.mxu1 %v1929_v47  ;;  %v2011_v46 = vld [vmem:[#allocation8 + $0xc0] sm:$0xff]  }
 0x13a   :  { %1083 = vmatprep.subr.bf16.mxu0 %v1934_v48  ;;  %1165 = vmatprep.subr.bf16.mxu1 %v1937_v49  ;;  %v2012_v47 = vld [vmem:[#allocation8] sm:$0xff]   ;;  %v244_v49 = vpack.c.bf16 %v240_v45, %v240_v45 }
 0x13b   :  { %v2013_v48 = vld [vmem:[#allocation8 + $0x80] sm:$0xff]  }
 0x13d   :  { %1084 = vmatpush1.bf16.msra.mxu0 %v1932_v50  ;;  %1166 = vmatpush1.bf16.msra.mxu1 %v1935_v51  ;;  %v2015_v50 = vld [vmem:[#allocation8 + $0xc8] sm:$0xff]  }
 0x13e   :  { %1085 = vmatprep.subr.bf16.mxu0 %v1940_v52  ;;  %1167 = vmatprep.subr.bf16.mxu1 %v1943_v53  ;;  %v2016_v51 = vld [vmem:[#allocation8 + $0x8] sm:$0xff]   ;;  %v2018_v53 = vld [vmem:[#allocation8 + $0x50] sm:$0xff]  }
 0x13f   :  { %v2017_v52 = vld [vmem:[#allocation8 + $0x88] sm:$0xff]  }
 0x141   :  { %1086 = vmatpush1.bf16.msra.mxu0 %v1938_v54  ;;  %1168 = vmatpush1.bf16.msra.mxu1 %v1941_v55  ;;  %v2019_v54 = vld [vmem:[#allocation8 + $0xd0] sm:$0xff]  }
 0x142   :  { %1087 = vmatprep.subr.bf16.mxu0 %v1946_v56  ;;  %1169 = vmatprep.subr.bf16.mxu1 %v1949_v57  ;;  %v2020_v55 = vld [vmem:[#allocation8 + $0x10] sm:$0xff]   ;;  %v2022_v57 = vld [vmem:[#allocation8 + $0x58] sm:$0xff]  }
 0x143   :  { %v2021_v56 = vld [vmem:[#allocation8 + $0x90] sm:$0xff]  }
 0x145   :  { %1088 = vmatpush1.bf16.msra.mxu0 %v1944_v58  ;;  %1170 = vmatpush1.bf16.msra.mxu1 %v1947_v59  ;;  %v2023_v58 = vld [vmem:[#allocation8 + $0xd8] sm:$0xff]  }
 0x146   :  { %1089 = vmatprep.subr.bf16.mxu0 %v1952_v60  ;;  %1171 = vmatprep.subr.bf16.mxu1 %v1955_v61  ;;  %v2024_v59 = vld [vmem:[#allocation8 + $0x18] sm:$0xff]   ;;  %v2026_v61 = vld [vmem:[#allocation8 + $0x60] sm:$0xff]  }
 0x147   :  { %v2025_v60 = vld [vmem:[#allocation8 + $0x98] sm:$0xff]  }
 0x149   :  { %1090 = vmatpush1.bf16.msra.mxu0 %v1950_v62  ;;  %1172 = vmatpush1.bf16.msra.mxu1 %v1953_v63  ;;  %v2027_v62 = vld [vmem:[#allocation8 + $0xe0] sm:$0xff]  }
 0x14a   :  { %1091 = vmatprep.subr.bf16.mxu0 %v1958_v0  ;;  %1173 = vmatprep.subr.bf16.mxu1 %v1961_v1  ;;  %v2028_v63 = vld [vmem:[#allocation8 + $0x20] sm:$0xff]   ;;  %v2030_v1 = vld [vmem:[#allocation8 + $0x68] sm:$0xff]  }
 0x14b   :  { %v2029_v0 = vld [vmem:[#allocation8 + $0xa0] sm:$0xff]  }
 0x14d   :  { %1092 = vmatpush1.bf16.msra.mxu0 %v1956_v2  ;;  %1174 = vmatpush1.bf16.msra.mxu1 %v1959_v3  ;;  %v2031_v2 = vld [vmem:[#allocation8 + $0xe8] sm:$0xff]  }
 0x14e   :  { %1093 = vmatprep.subr.bf16.mxu0 %v1964_v4  ;;  %1175 = vmatprep.subr.bf16.mxu1 %v1967_v5  ;;  %v2032_v3 = vld [vmem:[#allocation8 + $0x28] sm:$0xff]   ;;  %v2034_v5 = vld [vmem:[#allocation8 + $0x70] sm:$0xff]  }
 0x14f   :  { %v2033_v4 = vld [vmem:[#allocation8 + $0xa8] sm:$0xff]  }
 0x151   :  { %1094 = vmatpush1.bf16.msra.mxu0 %v1962_v6  ;;  %1176 = vmatpush1.bf16.msra.mxu1 %v1965_v7  ;;  %v2035_v6 = vld [vmem:[#allocation8 + $0xf0] sm:$0xff]  }
 0x152   :  { %1095 = vmatprep.subr.bf16.mxu0 %v1970_v8  ;;  %1177 = vmatprep.subr.bf16.mxu1 %v1973_v9  ;;  %v2036_v7 = vld [vmem:[#allocation8 + $0x30] sm:$0xff]   ;;  %v2038_v9 = vld [vmem:[#allocation8 + $0x78] sm:$0xff]  }
 0x153   :  { %v2037_v8 = vld [vmem:[#allocation8 + $0xb0] sm:$0xff]  }
 0x155   :  { %1096 = vmatpush1.bf16.msra.mxu0 %v1968_v10  ;;  %1178 = vmatpush1.bf16.msra.mxu1 %v1971_v11  ;;  %v2039_v10 = vld [vmem:[#allocation8 + $0xf8] sm:$0xff]  }
 0x156   :  { %1097 = vmatprep.subr.bf16.mxu0 %v1976_v12  ;;  %1179 = vmatprep.subr.bf16.mxu1 %v1979_v17  ;;  %v2040_v11 = vld [vmem:[#allocation8 + $0x38] sm:$0xff]  }
 0x157   :  { %v2041_v12 = vld [vmem:[#allocation8 + $0xb8] sm:$0xff]  }
 0x158   :  { %v374_v17 = vld [vmem:[%s2320_s4] sm:$0xf] }
 0x159   :  { %1098 = vmatpush1.bf16.msra.mxu0 %v1974_v19  ;;  %1180 = vmatpush1.bf16.msra.mxu1 %v1977_v20  ;;  %v379_v19 = vrot.slane %v374_v17, %v94_v14  ;;  %v387_v20 = vrot.slane %v374_v17, %v102_v30 }
 0x15a   :  { %1099 = vmatprep.subr.bf16.mxu0 %v1982_v21  ;;  %1181 = vmatprep.subr.bf16.mxu1 %v1985_v22  ;;  %v383_v21 = vrot.slane %v374_v17, %v98_v16  ;;  %v391_v22 = vrot.slane %v374_v17, %v106_v18 }
 0x15d   :  { %1100 = vmatpush1.bf16.msra.mxu0 %v1980_v23  ;;  %1182 = vmatpush1.bf16.msra.mxu1 %v1983_v24 }
 0x15e   :  { %1101 = vmatprep.subr.bf16.mxu0 %v1988_v25  ;;  %1183 = vmatprep.subr.bf16.mxu1 %v1991_v26 }
 0x161   :  { %1102 = vmatpush1.bf16.msra.mxu0 %v1986_v27  ;;  %1184 = vmatpush1.bf16.msra.mxu1 %v1989_v29 }
 0x162   :  { %1103 = vmatprep.subr.bf16.mxu0 %v1994_v31  ;;  %1185 = vmatprep.subr.bf16.mxu1 %v1997_v32 }
 0x165   :  { %1104 = vmatpush1.bf16.msra.mxu0 %v1992_v33  ;;  %1186 = vmatpush1.bf16.msra.mxu1 %v1995_v34 }
 0x166   :  { %1105 = vmatprep.subr.bf16.mxu0 %v2000_v36  ;;  %1187 = vmatprep.subr.bf16.mxu1 %v2003_v37 }
 0x169   :  { %1106 = vmatpush1.bf16.msra.mxu0 %v1998_v38  ;;  %1188 = vmatpush1.bf16.msra.mxu1 %v2001_v39 }
 0x16a   :  { %1107 = vmatprep.subr.bf16.mxu0 %v2006_v41  ;;  %1189 = vmatprep.subr.bf16.mxu1 %v2009_v42  ;;  %v1707_v42 = vld [vmem:[%s2322_s6] ss:$0 sm:$0xff] }
 0x16d   :  { %1108 = vmatpush1.bf16.msra.mxu0 %v2004_v43  ;;  %1190 = vmatpush1.bf16.msra.mxu1 %v2007_v44 }
 0x16e   :  { %1740 = vmatprep.subr.bf16.mxu0 %v2010_v15  ;;  %1762 = vmatprep.subr.bf16.mxu1 %v2011_v46 }
 0x170   :  { %1110 = vmatmul.mubr.bf16.vlgmr.msra.gmra.mrb[4].mxu0 %v244_v49  ;;  %1192 = vmatmul.mubr.bf16.vlgmr.msra.gmra.mrb[4].mxu1 %v244_v49 }
 0x171   :  { %1741 = vmatpush3.bf16.msra.mxu0 %v2012_v47  ;;  %1763 = vmatpush3.bf16.msra.mxu1 %v2013_v48 }
 0x172   :  { %1742 = vmatprep.subr.bf16.mxu0 %v2014_v28  ;;  %1764 = vmatprep.subr.bf16.mxu1 %v2015_v50 }
 0x175   :  { %1743 = vmatpush3.bf16.msra.mxu0 %v2016_v51  ;;  %1765 = vmatpush3.bf16.msra.mxu1 %v2017_v52 }
 0x176   :  { %1744 = vmatprep.subr.bf16.mxu0 %v2018_v53  ;;  %1766 = vmatprep.subr.bf16.mxu1 %v2019_v54 }
 0x179   :  { %1745 = vmatpush3.bf16.msra.mxu0 %v2020_v55  ;;  %1767 = vmatpush3.bf16.msra.mxu1 %v2021_v56 }
 0x17a   :  { %1746 = vmatprep.subr.bf16.mxu0 %v2022_v57  ;;  %1768 = vmatprep.subr.bf16.mxu1 %v2023_v58 }
 0x17d   :  { %1747 = vmatpush3.bf16.msra.mxu0 %v2024_v59  ;;  %1769 = vmatpush3.bf16.msra.mxu1 %v2025_v60 }
 0x17e   :  { %1748 = vmatprep.subr.bf16.mxu0 %v2026_v61  ;;  %1770 = vmatprep.subr.bf16.mxu1 %v2027_v62 }
 0x181   :  { %1749 = vmatpush3.bf16.msra.mxu0 %v2028_v63  ;;  %1771 = vmatpush3.bf16.msra.mxu1 %v2029_v0 }
 0x182   :  { %1750 = vmatprep.subr.bf16.mxu0 %v2030_v1  ;;  %1772 = vmatprep.subr.bf16.mxu1 %v2031_v2 }
 0x185   :  { %1751 = vmatpush3.bf16.msra.mxu0 %v2032_v3  ;;  %1773 = vmatpush3.bf16.msra.mxu1 %v2033_v4 }
 0x186   :  { %1752 = vmatprep.subr.bf16.mxu0 %v2034_v5  ;;  %1774 = vmatprep.subr.bf16.mxu1 %v2035_v6 }
 0x189   :  { %1753 = vmatpush3.bf16.msra.mxu0 %v2036_v7  ;;  %1775 = vmatpush3.bf16.msra.mxu1 %v2037_v8 }
 0x18a   :  { %1754 = vmatprep.subr.bf16.mxu0 %v2038_v9  ;;  %1776 = vmatprep.subr.bf16.mxu1 %v2039_v10 }
 0x18d   :  { %1755 = vmatpush3.bf16.msra.mxu0 %v2040_v11  ;;  %1777 = vmatpush3.bf16.msra.mxu1 %v2041_v12 }
 0x243   :  { %v1111_v23 = vpop.f32.mrb[4].mxu0  ;;  %v1193_v24 = vpop.f32.mrb[4].mxu1 }
 0x244   :  { %v1784_v25 = vadd.f32 %v1111_v23, %v379_v19  ;;  %v1786_v26 = vadd.f32 %v1193_v24, %v387_v20  ;;  %v1113_v27 = vpop.f32.mrb[5].mxu0  ;;  %v1195_v29 = vpop.f32.mrb[5].mxu1 }
 0x245   :  { %v1785_v31 = vadd.f32 %v1113_v27, %v383_v21  ;;  %v1787_v32 = vadd.f32 %v1195_v29, %v391_v22  ;;  %v1115_v33 = vpop.f32.mrb[6].mxu0  ;;  %v1197_v34 = vpop.f32.mrb[6].mxu1 }
 0x246   :  { %v1200_v14 = vmax.f32 %v1784_v25, 0.0  ;;  %v1202_v35 = vmax.f32 %v1786_v26, 0.0  ;;  %v1116_v36 = vpop.f32.mrb[7].mxu0  ;;  %v1198_v30 = vpop.f32.mrb[7].mxu1 }
 0x247   :  { %v1201_v37 = vmax.f32 %v1785_v31, 0.0  ;;  %v1203_v38 = vmax.f32 %v1787_v32, 0.0 }
 0x248   :  { %v1204_v13 = vpack.c.bf16 %v1200_v14, %v1200_v14  ;;  %v1206_v18 = vpack.c.bf16 %v1202_v35, %v1202_v35 }
 0x249   :  { %v1205_v16 = vpack.c.bf16 %v1201_v37, %v1201_v37  ;;  %v1207_v39 = vpack.c.bf16 %v1203_v38, %v1203_v38 }
 0x24b   :  { %1503 = vmatprep.mubr.bf16.mxu0 %v1205_v16  ;;  %1543 = vmatprep.mubr.bf16.mxu1 %v1207_v39 }
 0x24c   :  { %1504 = vmatmul.mubr.bf16.vlgmr.msra.gmra.mrb[8].mxu0 %v1204_v13  ;;  %1544 = vmatmul.mubr.bf16.vlgmr.msra.gmra.mrb[8].mxu1 %v1206_v18 }
 0x31f   :  { %v1756_v40 = vpop.f32.mrb[8].mxu0  ;;  %v1778_v41 = vpop.f32.mrb[8].mxu1 }
 0x320   :  { %v1757_v43 = vpop.f32.mrb[9].mxu0  ;;  %v1779_v44 = vpop.f32.mrb[9].mxu1 }
 0x321   :  { %v1758_v45 = vadd.f32 %v1757_v43, %v1756_v40  ;;  %v1780_v15 = vadd.f32 %v1779_v44, %v1778_v41  ;;  %v1759_v46 = vpop.f32.mrb[10].mxu0  ;;  %v1781_v47 = vpop.f32.mrb[10].mxu1 }
 0x322   :  { %v1760_v48 = vpop.f32.mrb[11].mxu0  ;;  %v1782_v49 = vpop.f32.mrb[11].mxu1 }
 0x323   :  { %v1506_v28 = vadd.f32 %v1758_v45, %v1707_v42 }
 0x325   :  { %v1546_v50 = vadd.f32 %v1780_v15, %v1506_v28 }
 0x327   :  { %1551 = vst [vmem:[#allocation10] sm:$0xff] %v1546_v50 }
 0x328   :  { %2141 = shalt.err (!%p2138_p8)
}
 0x329   :  { %s2142_s10 = scalar_lea.hbm %s2323_s7, 128 }
 0x32a   :  { %p2143_p9 = scmp.ne.s32.totalorder %s2323_s7, %s2142_s10  ;;  %p2146_p10 = scmp.lt.u32.totalorder %s2142_s10, %s2323_s7 }
 0x32c   :  { %p2148_p11 = pnand %p2146_p10, %p2143_p9 }
 0x32e   :  { %2151 = shalt.err (!%p2148_p11)
}
 0x32f   :  { %1561 = dma.vmem_to_hbm [thread:$0]  %s1559_s30, 128, %s2323_s7, [#allocation4]  }
 0x330   :  { %2158 = dma.done.wait [#allocation4], 128  }
 0x331   :  { %2159 = vsyncadd [#allocation4], 4294967168 }
 0x332   :  { %1565 = vsyncpa [#allocation3], 1 }
 0x333   :  { %1566 = vsyncpa [#allocation6], 1 }
 0x334   :  { %1567 = vsyncpa [#allocation9], 1 }
 0x335   :  { %1568 = vsyncpa [#allocation4], 1 }

</bundles_post_ra>
